<compile_context>
chip_gen: v6e
topology: v6e:2x2x1
jax: 0.10.0
libtpu: 0.0.40
codegen_flags: <defaults>
</compile_context>

<pallas_src>
import functools

import jax
import jax.numpy as jnp
from jax.experimental import pallas as pl
from jax.experimental.pallas import tpu as pltpu

NEGATIVE_SLOPE = 1.0 / 100.0
HIDDEN = (400, 300)          # logical widths (match the PyTorch module)
IN_PAD = 128                 # state_dim + action_dim (23) padded to a lane multiple
H1_PAD = 512                 # 400 -> 512
H2_PAD = 384                 # 300 -> 384
OUT_PAD = 128                # 1 -> 128 (lane-dense output store)
TILE_B = 512                 # batch tile (per perf review); ~3 MiB live VMEM


def _round_up(n, m):
    return ((n + m - 1) // m) * m


def _leaky_relu(x):
    # slope < 1  =>  leaky_relu(x) == max(x, slope * x)  (one vmul + one vmax)
    return jnp.maximum(x, NEGATIVE_SLOPE * x)


def _use_bf16_pointwise():
    """bf16 VALU activations on v6e/v7x; keep f32 pointwise on v5x and older."""
    try:
        kind = jax.devices()[0].device_kind.lower()
    except Exception:  # pragma: no cover - be permissive off-TPU
        return True
    return not any(tag in kind for tag in ("v2", "v3", "v4", "v5"))


def discriminator_kernel(x_ref, w1_ref, b1_ref, w2_ref, b2_ref, w3_ref, b3_ref,
                         out_ref, *, bf16_pointwise):
    # x tile: [tile_b, IN_PAD] bf16.  Weights: bf16 [in, out].  Biases: f32 [1, out].
    x = x_ref[...]

    def linear_act(h, w_ref, b_ref):
        y = jnp.dot(h, w_ref[...], preferred_element_type=jnp.float32) + b_ref[...]
        if bf16_pointwise:
            # Cast first, activation in bf16 (2 rows / vreg on v6e/v7x VALUs).
            return _leaky_relu(y.astype(jnp.bfloat16))
        # v5e path: f32 pointwise (free filler under the MXU), cast for next dot.
        return _leaky_relu(y).astype(jnp.bfloat16)

    # Layer 1: Linear(IN_PAD -> H1_PAD) + LeakyReLU
    h1 = linear_act(x, w1_ref, b1_ref)
    # Layer 2: Linear(H1_PAD -> H2_PAD) + LeakyReLU
    h2 = linear_act(h1, w2_ref, b2_ref)
    # Layer 3: Linear(H2_PAD -> OUT_PAD) + Sigmoid (lane-dense store; padded
    # lanes hold sigmoid(0)=0.5 and are sliced off in the wrapper).
    h3 = jnp.dot(h2, w3_ref[...], preferred_element_type=jnp.float32) + b3_ref[...]
    out_ref[...] = jax.nn.sigmoid(h3)


def _choose_tile_b(batch, tile_b):
    b_aligned = _round_up(batch, 8)
    tile_b = min(tile_b, b_aligned)
    # Keep >= 2 evenly split grid steps when the batch allows it, so both v7x
    # TensorCores get work (no effect on single-TC v5e/v6e correctness).
    half = _round_up((b_aligned + 1) // 2, 8)
    if b_aligned >= 16 and tile_b > half:
        tile_b = half
    return tile_b


def discriminator_forward(x, params, *, tile_b=TILE_B):
    """x: [B, state_dim + action_dim] float32 -> [B, 1] float32 in (0, 1)."""
    w1, b1, w2, b2, w3, b3 = params
    B, feat = x.shape
    in_pad = w1.shape[0]
    out_pad = w3.shape[1]

    tile_b = _choose_tile_b(B, tile_b)
    b_pad = _round_up(B, tile_b)

    # Feature pad 23 -> IN_PAD and bf16 cast.  allow_input_fusion lets XLA fuse
    # this producer into the pallas_call input instead of materializing it.
    x_p = jnp.zeros((b_pad, in_pad), jnp.bfloat16)
    x_p = x_p.at[:B, :feat].set(x.astype(jnp.bfloat16))

    grid = (b_pad // tile_b,)

    x_spec = pl.BlockSpec((tile_b, in_pad), lambda i: (i, 0))
    out_spec = pl.BlockSpec((tile_b, out_pad), lambda i: (i, 0))
    # Constant index_map -> the ~0.6 MB of bf16 weights stay resident in VMEM.
    param_specs = [pl.BlockSpec(p.shape, lambda i: (0, 0))
                   for p in (w1, b1, w2, b2, w3, b3)]

    # Cost hint computed from the padded shapes the kernel actually executes.
    flops = 2 * b_pad * (w1.shape[0] * w1.shape[1]
                         + w2.shape[0] * w2.shape[1]
                         + w3.shape[0] * w3.shape[1])
    transcendentals = b_pad * out_pad  # sigmoid over the lane-dense output block
    bytes_accessed = (x_p.size * x_p.dtype.itemsize
                      + sum(int(p.size) * p.dtype.itemsize for p in params)
                      + b_pad * out_pad * 4)

    kernel = functools.partial(discriminator_kernel,
                               bf16_pointwise=_use_bf16_pointwise())

    out = pl.pallas_call(
        kernel,
        out_shape=jax.ShapeDtypeStruct((b_pad, out_pad), jnp.float32),
        grid=grid,
        in_specs=[x_spec] + param_specs,
        out_specs=out_spec,
        compiler_params=pltpu.CompilerParams(
            dimension_semantics=("parallel",),
            allow_input_fusion=[True, False, False, False, False, False, False]),
        cost_estimate=pl.CostEstimate(
            flops=flops, transcendentals=transcendentals,
            bytes_accessed=bytes_accessed),
    )(x_p, w1, b1, w2, b2, w3, b3)

    return out[:B, :1]


def init_params(key, state_dim, action_dim):
    """nn.Linear-style init (uniform +-1/sqrt(fan_in)), stored [in, out],
    zero-padded to lane-aligned shapes, weights in bf16, biases in f32."""
    in_dim = state_dim + action_dim
    dims = [(in_dim, HIDDEN[0], IN_PAD, H1_PAD),
            (HIDDEN[0], HIDDEN[1], H1_PAD, H2_PAD),
            (HIDDEN[1], 1, H2_PAD, OUT_PAD)]
    params = []
    for fan_in, fan_out, in_p, out_p in dims:
        key, kw, kb = jax.random.split(key, 3)
        bound = 1.0 / (float(fan_in) ** 0.5)
        w = jax.random.uniform(kw, (fan_in, fan_out), jnp.float32, -bound, bound)
        b = jax.random.uniform(kb, (fan_out,), jnp.float32, -bound, bound)
        w_pad = jnp.zeros((in_p, out_p), jnp.float32).at[:fan_in, :fan_out].set(w)
        b_pad = jnp.zeros((1, out_p), jnp.float32).at[0, :fan_out].set(b)
        params.extend([w_pad.astype(jnp.bfloat16), b_pad])
    return tuple(params)


def reference_forward(x, params, *, bf16_pointwise):
    """Pure-JAX reference mirroring the kernel's padded bf16 arithmetic."""
    w1, b1, w2, b2, w3, b3 = params
    feat = x.shape[1]
    x_p = jnp.zeros((x.shape[0], w1.shape[0]), jnp.bfloat16)
    x_p = x_p.at[:, :feat].set(x.astype(jnp.bfloat16))

    def linear_act(h, w, b, act):
        y = jnp.dot(h, w, preferred_element_type=jnp.float32) + b
        if not act:
            return y
        if bf16_pointwise:
            return _leaky_relu(y.astype(jnp.bfloat16))
        return _leaky_relu(y).astype(jnp.bfloat16)

    h1 = linear_act(x_p, w1, b1, True)
    h2 = linear_act(h1, w2, b2, True)
    h3 = linear_act(h2, w3, b3, False)
    return jax.nn.sigmoid(h3)[:, :1]


if __name__ == "__main__":
    key = jax.random.PRNGKey(0)
    state_dim, action_dim = 17, 6
    bf16_act = _use_bf16_pointwise()

    kp, kx_small, kx_big = jax.random.split(key, 3)
    params = init_params(kp, state_dim, action_dim)

    # Small batch (single grid step, tile == full batch).
    x_small = jax.random.normal(kx_small, (8, state_dim + action_dim), jnp.float32)
    out_small = jax.block_until_ready(discriminator_forward(x_small, params))
    ref_small = reference_forward(x_small, params, bf16_pointwise=bf16_act)
    assert out_small.shape == (8, 1)
    assert jnp.allclose(out_small, ref_small, atol=1e-3, rtol=1e-3)
    assert bool(jnp.all((out_small > 0.0) & (out_small < 1.0)))

    # Larger, non-multiple batch: exercises the 2-step grid + batch padding path.
    x_big = jax.random.normal(kx_big, (1000, state_dim + action_dim), jnp.float32)
    out_big = jax.block_until_ready(discriminator_forward(x_big, params))
    ref_big = reference_forward(x_big, params, bf16_pointwise=bf16_act)
    assert out_big.shape == (1000, 1)
    assert jnp.allclose(out_big, ref_big, atol=1e-3, rtol=1e-3)

    print("KERNEL_OK")
</pallas_src>

<mosaic_0001>
module attributes {stable_mosaic.version = 11 : i64} {
  func.func @discriminator_kernel(%arg0: i32, %arg1: memref<8x128xbf16, #tpu.memory_space<vmem>>, %arg2: memref<128x512xbf16, #tpu.memory_space<vmem>>, %arg3: memref<1x512xf32, #tpu.memory_space<vmem>>, %arg4: memref<512x384xbf16, #tpu.memory_space<vmem>>, %arg5: memref<1x384xf32, #tpu.memory_space<vmem>>, %arg6: memref<384x128xbf16, #tpu.memory_space<vmem>>, %arg7: memref<1x128xf32, #tpu.memory_space<vmem>>, %arg8: memref<8x128xf32, #tpu.memory_space<vmem>>) attributes {dimension_semantics = [#tpu.dimension_semantics<parallel>], iteration_bounds = array<i64: 1>, scalar_prefetch = 0 : i64, scratch_operands = 0 : i64, tpu.core_type = #tpu.core_type<tc>, window_params = [{transform_indices = @transform_0, window_bounds = array<i64: 8, 128>}, {pipeline_mode = #tpu.pipeline_mode<synchronous>, transform_indices = @transform_1, window_bounds = array<i64: 128, 512>}, {pipeline_mode = #tpu.pipeline_mode<synchronous>, transform_indices = @transform_2, window_bounds = array<i64: 1, 512>}, {pipeline_mode = #tpu.pipeline_mode<synchronous>, transform_indices = @transform_3, window_bounds = array<i64: 512, 384>}, {pipeline_mode = #tpu.pipeline_mode<synchronous>, transform_indices = @transform_4, window_bounds = array<i64: 1, 384>}, {pipeline_mode = #tpu.pipeline_mode<synchronous>, transform_indices = @transform_5, window_bounds = array<i64: 384, 128>}, {pipeline_mode = #tpu.pipeline_mode<synchronous>, transform_indices = @transform_6, window_bounds = array<i64: 1, 128>}, {transform_indices = @transform_7, window_bounds = array<i64: 8, 128>}]} {
    %c0 = arith.constant 0 : index
    %c0_0 = arith.constant 0 : index
    %0 = vector.load %arg1[%c0, %c0_0] : memref<8x128xbf16, #tpu.memory_space<vmem>>, vector<8x128xbf16>
    %c0_1 = arith.constant 0 : index
    %c0_2 = arith.constant 0 : index
    %1 = vector.load %arg2[%c0_1, %c0_2] : memref<128x512xbf16, #tpu.memory_space<vmem>>, vector<128x512xbf16>
    %cst = arith.constant dense<0.000000e+00> : vector<8x512xf32>
    %2 = tpu.matmul %0, %1, %cst {dimension_numbers = #tpu.dot_dimension_numbers<[1], [0], [0], [1], [0, 0, 1, 1], [], []>} : vector<8x128xbf16>, vector<128x512xbf16>, vector<8x512xf32> -> vector<8x512xf32>
    %c0_3 = arith.constant 0 : index
    %c0_4 = arith.constant 0 : index
    %3 = vector.load %arg3[%c0_3, %c0_4] : memref<1x512xf32, #tpu.memory_space<vmem>>, vector<1x512xf32>
    %4 = vector.broadcast %3 : vector<1x512xf32> to vector<8x512xf32>
    %5 = arith.addf %2, %4 : vector<8x512xf32>
    %6 = arith.truncf %5 : vector<8x512xf32> to vector<8x512xbf16>
    %cst_5 = arith.constant 1.000980e-02 : bf16
    %7 = vector.broadcast %cst_5 : bf16 to vector<8x512xbf16>
    %8 = arith.mulf %7, %6 : vector<8x512xbf16>
    %9 = arith.maximumf %6, %8 : vector<8x512xbf16>
    %c0_6 = arith.constant 0 : index
    %c0_7 = arith.constant 0 : index
    %10 = vector.load %arg4[%c0_6, %c0_7] : memref<512x384xbf16, #tpu.memory_space<vmem>>, vector<512x384xbf16>
    %cst_8 = arith.constant dense<0.000000e+00> : vector<8x384xf32>
    %11 = tpu.matmul %9, %10, %cst_8 {dimension_numbers = #tpu.dot_dimension_numbers<[1], [0], [0], [1], [0, 0, 1, 1], [], []>} : vector<8x512xbf16>, vector<512x384xbf16>, vector<8x384xf32> -> vector<8x384xf32>
    %c0_9 = arith.constant 0 : index
    %c0_10 = arith.constant 0 : index
    %12 = vector.load %arg5[%c0_9, %c0_10] : memref<1x384xf32, #tpu.memory_space<vmem>>, vector<1x384xf32>
    %13 = vector.broadcast %12 : vector<1x384xf32> to vector<8x384xf32>
    %14 = arith.addf %11, %13 : vector<8x384xf32>
    %15 = arith.truncf %14 : vector<8x384xf32> to vector<8x384xbf16>
    %cst_11 = arith.constant 1.000980e-02 : bf16
    %16 = vector.broadcast %cst_11 : bf16 to vector<8x384xbf16>
    %17 = arith.mulf %16, %15 : vector<8x384xbf16>
    %18 = arith.maximumf %15, %17 : vector<8x384xbf16>
    %c0_12 = arith.constant 0 : index
    %c0_13 = arith.constant 0 : index
    %19 = vector.load %arg6[%c0_12, %c0_13] : memref<384x128xbf16, #tpu.memory_space<vmem>>, vector<384x128xbf16>
    %cst_14 = arith.constant dense<0.000000e+00> : vector<8x128xf32>
    %20 = tpu.matmul %18, %19, %cst_14 {dimension_numbers = #tpu.dot_dimension_numbers<[1], [0], [0], [1], [0, 0, 1, 1], [], []>} : vector<8x384xbf16>, vector<384x128xbf16>, vector<8x128xf32> -> vector<8x128xf32>
    %c0_15 = arith.constant 0 : index
    %c0_16 = arith.constant 0 : index
    %21 = vector.load %arg7[%c0_15, %c0_16] : memref<1x128xf32, #tpu.memory_space<vmem>>, vector<1x128xf32>
    %22 = vector.broadcast %21 : vector<1x128xf32> to vector<8x128xf32>
    %23 = arith.addf %20, %22 : vector<8x128xf32>
    %24 = arith.negf %23 : vector<8x128xf32>
    %25 = math.exp %24 : vector<8x128xf32>
    %cst_17 = arith.constant 1.000000e+00 : f32
    %26 = vector.broadcast %cst_17 : f32 to vector<8x128xf32>
    %27 = arith.addf %26, %25 : vector<8x128xf32>
    %28 = arith.divf %26, %27 : vector<8x128xf32>
    %c0_18 = arith.constant 0 : index
    %c0_19 = arith.constant 0 : index
    %29 = vector.load %arg8[%c0_18, %c0_19] : memref<8x128xf32, #tpu.memory_space<vmem>>, vector<8x128xf32>
    tpu.vector_store %arg8[%c0_18, %c0_19], %28 {strides = array<i32>} : memref<8x128xf32, #tpu.memory_space<vmem>>, vector<8x128xf32>,
    return
  }
  func.func @transform_0(%arg0: i32) -> (i32, i32) {
    %c0_i32 = arith.constant 0 : i32
    %c0_i32_0 = arith.constant 0 : i32
    return %arg0, %c0_i32 : i32, i32
  }
  func.func @transform_1(%arg0: i32) -> (i32, i32) {
    %c0_i32 = arith.constant 0 : i32
    %c0_i32_0 = arith.constant 0 : i32
    %c0_i32_1 = arith.constant 0 : i32
    return %c0_i32, %c0_i32_0 : i32, i32
  }
  func.func @transform_2(%arg0: i32) -> (i32, i32) {
    %c0_i32 = arith.constant 0 : i32
    %c0_i32_0 = arith.constant 0 : i32
    %c0_i32_1 = arith.constant 0 : i32
    return %c0_i32, %c0_i32_0 : i32, i32
  }
  func.func @transform_3(%arg0: i32) -> (i32, i32) {
    %c0_i32 = arith.constant 0 : i32
    %c0_i32_0 = arith.constant 0 : i32
    %c0_i32_1 = arith.constant 0 : i32
    return %c0_i32, %c0_i32_0 : i32, i32
  }
  func.func @transform_4(%arg0: i32) -> (i32, i32) {
    %c0_i32 = arith.constant 0 : i32
    %c0_i32_0 = arith.constant 0 : i32
    %c0_i32_1 = arith.constant 0 : i32
    return %c0_i32, %c0_i32_0 : i32, i32
  }
  func.func @transform_5(%arg0: i32) -> (i32, i32) {
    %c0_i32 = arith.constant 0 : i32
    %c0_i32_0 = arith.constant 0 : i32
    %c0_i32_1 = arith.constant 0 : i32
    return %c0_i32, %c0_i32_0 : i32, i32
  }
  func.func @transform_6(%arg0: i32) -> (i32, i32) {
    %c0_i32 = arith.constant 0 : i32
    %c0_i32_0 = arith.constant 0 : i32
    %c0_i32_1 = arith.constant 0 : i32
    return %c0_i32, %c0_i32_0 : i32, i32
  }
  func.func @transform_7(%arg0: i32) -> (i32, i32) {
    %c0_i32 = arith.constant 0 : i32
    %c0_i32_0 = arith.constant 0 : i32
    return %arg0, %c0_i32 : i32, i32
  }
}

</mosaic_0001>

<bundles_post_ra>
// kernel: tpu_custom_call.1
= control target key start
LH: loop header
LB: loop body
LE: loop exit
PB: predicated region body
PF: predicated region fallthrough
CT: control target
= control target key end

     0   :  { %12 = vsyncpa [#allocation3], 0  ;;  %s2234_s0 = inlined_call_operand.hbm [shape: bf16[8,128], index: 0, kind: input, shape index: {}]   ;;  %s2235_s1 = inlined_call_operand.hbm [shape: bf16[128,512], index: 1, kind: input, shape index: {}]   ;;  %s2236_s2 = inlined_call_operand.hbm [shape: f32[1,512], index: 2, kind: input, shape index: {}]   ;;  %s2237_s3 = inlined_call_operand.hbm [shape: bf16[512,384], index: 3, kind: input, shape index: {}]   ;;  %s2238_s4 = inlined_call_operand.vmem [shape: f32[1,384], index: 4, kind: input, shape index: {}]   ;;  %s2239_s5 = inlined_call_operand.hbm [shape: bf16[384,128], index: 5, kind: input, shape index: {}]   ;;  %s2240_s6 = inlined_call_operand.vmem [shape: f32[1,128], index: 6, kind: input, shape index: {}]   ;;  %s2241_s7 = inlined_call_operand.hbm [shape: f32[8,128], index: 7, kind: output, shape index: {}]  }
   0x1   :  { %13 = vsyncpa [#allocation6], 0 }
   0x2   :  { %14 = vsyncpa [#allocation9], 0 }
   0x3   :  { %15 = vsyncpa [#allocation4], 0  ;;  %s2129_s24 = smov [#allocation5]  }
   0x4   :  { %s31_s25 = sshll.u32 %s2129_s24, 4  ;;  %s32_s25 = int_to_ptr.vmem [resolvable:$true] %s31_s25 }
   0x5   :  { %s2009_s26 = scalar_lea.vmem %s32_s25, 4096  ;;  %p2014_p1 = scmp.lt.s32.totalorder %s32_s25, %s32_s25 }
   0x6   :  { %p2010_p0 = scmp.ne.s32.totalorder %s32_s25, %s2009_s26  ;;  %p2015_p2 = scmp.lt.s32.totalorder %s2009_s26, %s2009_s26 }
   0x8   :  { %p2016_p3 = por %p2015_p2, %p2014_p1 }
   0xa   :  { %p2017_p4 = pnand %p2016_p3, %p2010_p0 }
   0xc   :  { %2020 = shalt.err (!%p2017_p4)
}
   0xd   :  { %s2130_s27 = smov 256   ;;  %s2131_s28 = smov 16  }
   0xe   :  { %37 = dma.hbm_to_vmem [thread:$0]  %s2235_s1, 4096, %s32_s25, [#allocation6], %s2130_s27, %s2130_s27, %s2131_s28  }
   0xf   :  { %s2132_s8 = smov [#allocation8]  }
  0x10   :  { %s53_s9 = sshll.u32 %s2132_s8, 4  ;;  %s54_s9 = int_to_ptr.vmem [resolvable:$true] %s53_s9 }
  0x11   :  { %s2029_s10 = scalar_lea.vmem %s54_s9, 12288  ;;  %p2034_p6 = scmp.lt.s32.totalorder %s54_s9, %s54_s9 }
  0x12   :  { %p2030_p5 = scmp.ne.s32.totalorder %s54_s9, %s2029_s10  ;;  %p2035_p7 = scmp.lt.s32.totalorder %s2029_s10, %s2029_s10 }
  0x14   :  { %p2036_p8 = por %p2035_p7, %p2034_p6 }
  0x16   :  { %p2037_p9 = pnand %p2036_p8, %p2030_p5 }
  0x18   :  { %2040 = shalt.err (!%p2037_p9)
}
  0x19   :  { %s2133_s11 = smov 192   ;;  %s2134_s12 = smov 12  }
  0x1a   :  { %59 = dma.hbm_to_vmem [thread:$0]  %s2237_s3, 12288, %s54_s9, [#allocation9], %s2133_s11, %s2133_s11, %s2134_s12  }
  0x1b   :  { %s2135_s15 = smov [#allocation2]   ;;  %s2136_s17 = smov [#allocation7]  }
  0x1c   :  { %s22_s16 = sshll.u32 %s2135_s15, 4  ;;  %s44_s1 = sshll.u32 %s2136_s17, 4  ;;  %s23_s16 = int_to_ptr.vmem [resolvable:$true] %s22_s16  ;;  %s45_s1 = int_to_ptr.vmem [resolvable:$true] %s44_s1 }
  0x1d   :  { %s2049_s18 = scalar_lea.vmem %s23_s16, 64  ;;  %p2054_p11 = scmp.lt.s32.totalorder %s23_s16, %s23_s16 }
  0x1e   :  { %p2050_p10 = scmp.ne.s32.totalorder %s23_s16, %s2049_s18  ;;  %p2055_p12 = scmp.lt.s32.totalorder %s2049_s18, %s2049_s18 }
  0x20   :  { %p2056_p13 = por %p2055_p12, %p2054_p11 }
  0x22   :  { %p2057_p0 = pnand %p2056_p13, %p2050_p10 }
  0x24   :  { %2060 = shalt.err (!%p2057_p0)
}
  0x25   :  { %25 = dma.hbm_to_vmem [thread:$0]  %s2234_s0, 64, %s23_s16, [#allocation3]  }
  0x26   :  { %s2069_s21 = scalar_lea.vmem %s45_s1, 64  ;;  %p2074_p2 = scmp.lt.s32.totalorder %s45_s1, %s45_s1 }
  0x27   :  { %p2070_p1 = scmp.ne.s32.totalorder %s45_s1, %s2069_s21  ;;  %p2075_p3 = scmp.lt.s32.totalorder %s2069_s21, %s2069_s21 }
  0x29   :  { %p2076_p4 = por %p2075_p3, %p2074_p2 }
  0x2b   :  { %p2077_p5 = pnand %p2076_p4, %p2070_p1 }
  0x2d   :  { %2080 = shalt.err (!%p2077_p5)
}
  0x2e   :  { %47 = dma.hbm_to_vmem [thread:$0]  %s2236_s2, 64, %s45_s1, [#allocation6]  }
  0x2f   :  { %s2137_s23 = smov [#allocation10]  }
  0x30   :  { %s67_s24 = sshll.u32 %s2137_s23, 4  ;;  %s68_s24 = int_to_ptr.vmem [resolvable:$true] %s67_s24 }
  0x31   :  { %s2089_s25 = scalar_lea.vmem %s68_s24, 3072  ;;  %p2094_p7 = scmp.lt.s32.totalorder %s68_s24, %s68_s24 }
  0x32   :  { %p2090_p6 = scmp.ne.s32.totalorder %s68_s24, %s2089_s25  ;;  %p2095_p8 = scmp.lt.s32.totalorder %s2089_s25, %s2089_s25 }
  0x34   :  { %p2096_p9 = por %p2095_p8, %p2094_p7 }
  0x36   :  { %p2097_p10 = pnand %p2096_p9, %p2090_p6 }
  0x38   :  { %2100 = shalt.err (!%p2097_p10)
}
  0x39   :  { %s2138_s0 = smov 64   ;;  %s2139_s26 = smov 4  }
  0x3a   :  { %73 = dma.hbm_to_vmem [thread:$0]  %s2239_s5, 3072, %s68_s24, [#allocation9], %s2138_s0, %s2138_s0, %s2139_s26  }
  0x3b   :  { %2121 = dma.done.wait [#allocation3], 64  }
  0x3c   :  { %2122 = vsyncadd [#allocation3], 4294967232 }
  0x3d   :  { %2123 = dma.done.wait [#allocation6], 4160  }
  0x3e   :  { %2124 = vsyncadd [#allocation6], 4294963136 }
  0x3f   :  { %2125 = dma.done.wait [#allocation9], 15360  }
  0x40   :  { %2126 = vsyncadd [#allocation9], 4294951936  ;;  %v2140_v0 = vmov 0   ;;  %v1797_v1 = vld [vmem:[#allocation5 + $0xe4] ss:$16 sps:$4 sm:$0xff]   ;;  %vm2142_vm0 = vmmov 0  }
  0x41   :  { %340 = vmatprep.mubr.bf16.mxu0 %v2140_v0  ;;  %381 = vmatprep.mubr.bf16.mxu1 %v2140_v0  ;;  %v1799_v2 = vld [vmem:[#allocation5 + $0xec] ss:$16 sps:$4 sm:$0xff]   ;;  %v1801_v3 = vld [vmem:[#allocation5 + $0xe0] ss:$16 sps:$4 sm:$0xff]   ;;  %v1802_v4 = vld [vmem:[#allocation5 + $0xe8] ss:$16 sps:$4 sm:$0xff]  }
  0x42   :  { %308 = vmatprep.subr.bf16.mxu0 %v1797_v1  ;;  %349 = vmatprep.subr.bf16.mxu1 %v1799_v2  ;;  %v1803_v5 = vld [vmem:[#allocation5 + $0xc4] ss:$16 sps:$4 sm:$0xff]   ;;  %v1805_v6 = vld [vmem:[#allocation5 + $0xcc] ss:$16 sps:$4 sm:$0xff]   ;;  %v1807_v7 = vld [vmem:[#allocation5 + $0xc0] ss:$16 sps:$4 sm:$0xff]  }
  0x43   :  { %309 = vmatpush1.bf16.msra.mxu0 %v1801_v3  ;;  %350 = vmatpush1.bf16.msra.mxu1 %v1802_v4  ;;  %v1808_v8 = vld [vmem:[#allocation5 + $0xc8] ss:$16 sps:$4 sm:$0xff]   ;;  %v1809_v9 = vld [vmem:[#allocation5 + $0xa4] ss:$16 sps:$4 sm:$0xff]   ;;  %v1811_v10 = vld [vmem:[#allocation5 + $0xac] ss:$16 sps:$4 sm:$0xff]  }
  0x44   :  { %310 = vmatprep.subr.bf16.mxu0 %v1803_v5  ;;  %351 = vmatprep.subr.bf16.mxu1 %v1805_v6  ;;  %v1813_v11 = vld [vmem:[#allocation5 + $0xa0] ss:$16 sps:$4 sm:$0xff]   ;;  %v1814_v12 = vld [vmem:[#allocation5 + $0xa8] ss:$16 sps:$4 sm:$0xff]   ;;  %v1815_v13 = vld [vmem:[#allocation5 + $0x84] ss:$16 sps:$4 sm:$0xff]  }
  0x45   :  { %v1817_v14 = vld [vmem:[#allocation5 + $0x8c] ss:$16 sps:$4 sm:$0xff]   ;;  %v1819_v15 = vld [vmem:[#allocation5 + $0x80] ss:$16 sps:$4 sm:$0xff]   ;;  %v1820_v16 = vld [vmem:[#allocation5 + $0x88] ss:$16 sps:$4 sm:$0xff]  }
  0x46   :  { %v1821_v17 = vld [vmem:[#allocation5 + $0x64] ss:$16 sps:$4 sm:$0xff]   ;;  %v1823_v18 = vld [vmem:[#allocation5 + $0x6c] ss:$16 sps:$4 sm:$0xff]   ;;  %v1825_v19 = vld [vmem:[#allocation5 + $0x60] ss:$16 sps:$4 sm:$0xff]  }
  0x47   :  { %311 = vmatpush1.bf16.msra.mxu0 %v1807_v7  ;;  %352 = vmatpush1.bf16.msra.mxu1 %v1808_v8  ;;  %v1826_v20 = vld [vmem:[#allocation5 + $0x68] ss:$16 sps:$4 sm:$0xff]   ;;  %v1827_v21 = vld [vmem:[#allocation5 + $0x44] ss:$16 sps:$4 sm:$0xff]   ;;  %v1829_v22 = vld [vmem:[#allocation5 + $0x4c] ss:$16 sps:$4 sm:$0xff]  }
  0x48   :  { %312 = vmatprep.subr.bf16.mxu0 %v1809_v9  ;;  %353 = vmatprep.subr.bf16.mxu1 %v1811_v10  ;;  %v1831_v23 = vld [vmem:[#allocation5 + $0x40] ss:$16 sps:$4 sm:$0xff]   ;;  %v1832_v24 = vld [vmem:[#allocation5 + $0x48] ss:$16 sps:$4 sm:$0xff]   ;;  %v1833_v25 = vld [vmem:[#allocation5 + $0x24] ss:$16 sps:$4 sm:$0xff]  }
  0x49   :  { %v1835_v26 = vld [vmem:[#allocation5 + $0x2c] ss:$16 sps:$4 sm:$0xff]   ;;  %v1837_v27 = vld [vmem:[#allocation5 + $0x20] ss:$16 sps:$4 sm:$0xff]   ;;  %v1838_v28 = vld [vmem:[#allocation5 + $0x28] ss:$16 sps:$4 sm:$0xff]  }
  0x4a   :  { %v1839_v29 = vld [vmem:[#allocation5 + $0x4] ss:$16 sps:$4 sm:$0xff]   ;;  %v1841_v30 = vld [vmem:[#allocation5 + $0xc] ss:$16 sps:$4 sm:$0xff]   ;;  %v1843_v31 = vld [vmem:[#allocation5] ss:$16 sps:$4 sm:$0xff]  }
  0x4b   :  { %313 = vmatpush1.bf16.msra.mxu0 %v1813_v11  ;;  %354 = vmatpush1.bf16.msra.mxu1 %v1814_v12  ;;  %v1844_v32 = vld [vmem:[#allocation5 + $0x8] ss:$16 sps:$4 sm:$0xff]   ;;  %v1847_v33 = vld [vmem:[#allocation8 + $0xac] ss:$12 sps:$4 sm:$0xff]   ;;  %v1851_v40 = vld [vmem:[#allocation8 + $0x90] ss:$12 sps:$4 sm:$0xff]  }
  0x4c   :  { %314 = vmatprep.subr.bf16.mxu0 %v1815_v13  ;;  %355 = vmatprep.subr.bf16.mxu1 %v1817_v14  ;;  %v1850_v34 = vld [vmem:[#allocation8 + $0x22c] ss:$12 sps:$4 sm:$0xff]   ;;  %v1845_v36 = vld [vmem:[#allocation8 + $0xa8] ss:$12 sps:$4 sm:$0xff]   ;;  %v1854_v41 = vld [vmem:[#allocation8 + $0x210] ss:$12 sps:$4 sm:$0xff]  }
  0x4d   :  { %v93_v35 = vld [vmem:[#allocation2] sm:$0xf]  ;;  %v1848_v37 = vld [vmem:[#allocation8 + $0x228] ss:$12 sps:$4 sm:$0xff]   ;;  %v1865_v46 = vld [vmem:[#allocation8 + $0x64] ss:$12 sps:$4 sm:$0xff]  }
  0x4e   :  { %v1853_v38 = vld [vmem:[#allocation8 + $0x94] ss:$12 sps:$4 sm:$0xff]   ;;  %v1859_v42 = vld [vmem:[#allocation8 + $0x7c] ss:$12 sps:$4 sm:$0xff]   ;;  %v1857_v44 = vld [vmem:[#allocation8 + $0x78] ss:$12 sps:$4 sm:$0xff]  }
  0x4f   :  { %315 = vmatpush1.bf16.msra.mxu0 %v1819_v15  ;;  %356 = vmatpush1.bf16.msra.mxu1 %v1820_v16  ;;  %v1856_v39 = vld [vmem:[#allocation8 + $0x214] ss:$12 sps:$4 sm:$0xff]   ;;  %v1862_v43 = vld [vmem:[#allocation8 + $0x1fc] ss:$12 sps:$4 sm:$0xff]   ;;  %v1860_v45 = vld [vmem:[#allocation8 + $0x1f8] ss:$12 sps:$4 sm:$0xff]  }
  0x50   :  { %316 = vmatprep.subr.bf16.mxu0 %v1821_v17  ;;  %357 = vmatprep.subr.bf16.mxu1 %v1823_v18  ;;  %v1868_v47 = vld [vmem:[#allocation8 + $0x1e4] ss:$12 sps:$4 sm:$0xff]   ;;  %v1863_v48 = vld [vmem:[#allocation8 + $0x60] ss:$12 sps:$4 sm:$0xff]   ;;  %v1869_v52 = vld [vmem:[#allocation8 + $0x48] ss:$12 sps:$4 sm:$0xff]  }
  0x51   :  { %v1866_v49 = vld [vmem:[#allocation8 + $0x1e0] ss:$12 sps:$4 sm:$0xff]   ;;  %v1872_v53 = vld [vmem:[#allocation8 + $0x1c8] ss:$12 sps:$4 sm:$0xff]   ;;  %v1875_v56 = vld [vmem:[#allocation8 + $0x30] ss:$12 sps:$4 sm:$0xff]  }
  0x52   :  { %v1871_v50 = vld [vmem:[#allocation8 + $0x4c] ss:$12 sps:$4 sm:$0xff]   ;;  %v1877_v54 = vld [vmem:[#allocation8 + $0x34] ss:$12 sps:$4 sm:$0xff]   ;;  %v1878_v57 = vld [vmem:[#allocation8 + $0x1b0] ss:$12 sps:$4 sm:$0xff]  }
  0x53   :  { %317 = vmatpush1.bf16.msra.mxu0 %v1825_v19  ;;  %358 = vmatpush1.bf16.msra.mxu1 %v1826_v20  ;;  %v1874_v51 = vld [vmem:[#allocation8 + $0x1cc] ss:$12 sps:$4 sm:$0xff]   ;;  %v1880_v55 = vld [vmem:[#allocation8 + $0x1b4] ss:$12 sps:$4 sm:$0xff]   ;;  %v1883_v58 = vld [vmem:[#allocation8 + $0x1c] ss:$12 sps:$4 sm:$0xff]  }
  0x54   :  { %318 = vmatprep.subr.bf16.mxu0 %v1827_v21  ;;  %359 = vmatprep.subr.bf16.mxu1 %v1829_v22  ;;  %v1886_v59 = vld [vmem:[#allocation8 + $0x19c] ss:$12 sps:$4 sm:$0xff]   ;;  %v1881_v60 = vld [vmem:[#allocation8 + $0x18] ss:$12 sps:$4 sm:$0xff]   ;;  %v1887_v0 = vld [vmem:[#allocation8] ss:$12 sps:$4 sm:$0xff]  }
  0x55   :  { %v1884_v61 = vld [vmem:[#allocation8 + $0x198] ss:$12 sps:$4 sm:$0xff]   ;;  %v1890_v1 = vld [vmem:[#allocation8 + $0x180] ss:$12 sps:$4 sm:$0xff]   ;;  %v1893_v4 = vld [vmem:[#allocation8 + $0x168] ss:$12 sps:$4 sm:$0xff]  }
  0x56   :  { %v1889_v62 = vld [vmem:[#allocation8 + $0x4] ss:$12 sps:$4 sm:$0xff]   ;;  %v1895_v2 = vld [vmem:[#allocation8 + $0x16c] ss:$12 sps:$4 sm:$0xff]   ;;  %v1896_v5 = vld [vmem:[#allocation8 + $0x2e8] ss:$12 sps:$4 sm:$0xff]  }
  0x57   :  { %319 = vmatpush1.bf16.msra.mxu0 %v1831_v23  ;;  %360 = vmatpush1.bf16.msra.mxu1 %v1832_v24  ;;  %v1892_v63 = vld [vmem:[#allocation8 + $0x184] ss:$12 sps:$4 sm:$0xff]   ;;  %v1898_v3 = vld [vmem:[#allocation8 + $0x2ec] ss:$12 sps:$4 sm:$0xff]   ;;  %v1901_v6 = vld [vmem:[#allocation8 + $0x154] ss:$12 sps:$4 sm:$0xff]  }
  0x58   :  { %320 = vmatprep.subr.bf16.mxu0 %v1833_v25  ;;  %361 = vmatprep.subr.bf16.mxu1 %v1835_v26  ;;  %v1904_v7 = vld [vmem:[#allocation8 + $0x2d4] ss:$12 sps:$4 sm:$0xff]   ;;  %v1899_v8 = vld [vmem:[#allocation8 + $0x150] ss:$12 sps:$4 sm:$0xff]   ;;  %v1905_v12 = vld [vmem:[#allocation8 + $0x138] ss:$12 sps:$4 sm:$0xff]  }
  0x59   :  { %v1902_v9 = vld [vmem:[#allocation8 + $0x2d0] ss:$12 sps:$4 sm:$0xff]   ;;  %v1908_v13 = vld [vmem:[#allocation8 + $0x2b8] ss:$12 sps:$4 sm:$0xff]   ;;  %v1911_v16 = vld [vmem:[#allocation8 + $0x120] ss:$12 sps:$4 sm:$0xff]  }
  0x5a   :  { %v1907_v10 = vld [vmem:[#allocation8 + $0x13c] ss:$12 sps:$4 sm:$0xff]   ;;  %v1913_v14 = vld [vmem:[#allocation8 + $0x124] ss:$12 sps:$4 sm:$0xff]   ;;  %v1914_v17 = vld [vmem:[#allocation8 + $0x2a0] ss:$12 sps:$4 sm:$0xff]  }
  0x5b   :  { %321 = vmatpush1.bf16.msra.mxu0 %v1837_v27  ;;  %362 = vmatpush1.bf16.msra.mxu1 %v1838_v28  ;;  %v1910_v11 = vld [vmem:[#allocation8 + $0x2bc] ss:$12 sps:$4 sm:$0xff]   ;;  %v1916_v15 = vld [vmem:[#allocation8 + $0x2a4] ss:$12 sps:$4 sm:$0xff]   ;;  %v1919_v18 = vld [vmem:[#allocation8 + $0x10c] ss:$12 sps:$4 sm:$0xff]  }
  0x5c   :  { %322 = vmatprep.subr.bf16.mxu0 %v1839_v29  ;;  %363 = vmatprep.subr.bf16.mxu1 %v1841_v30  ;;  %v1922_v19 = vld [vmem:[#allocation8 + $0x28c] ss:$12 sps:$4 sm:$0xff]   ;;  %v1917_v20 = vld [vmem:[#allocation8 + $0x108] ss:$12 sps:$4 sm:$0xff]   ;;  %v1923_v24 = vld [vmem:[#allocation8 + $0xf0] ss:$12 sps:$4 sm:$0xff]  }
  0x5d   :  { %v1920_v21 = vld [vmem:[#allocation8 + $0x288] ss:$12 sps:$4 sm:$0xff]   ;;  %v1926_v25 = vld [vmem:[#allocation8 + $0x270] ss:$12 sps:$4 sm:$0xff]   ;;  %v1929_v28 = vld [vmem:[#allocation8 + $0xd8] ss:$12 sps:$4 sm:$0xff]  }
  0x5e   :  { %v1925_v22 = vld [vmem:[#allocation8 + $0xf4] ss:$12 sps:$4 sm:$0xff]   ;;  %v1931_v26 = vld [vmem:[#allocation8 + $0xdc] ss:$12 sps:$4 sm:$0xff]   ;;  %v1932_v29 = vld [vmem:[#allocation8 + $0x258] ss:$12 sps:$4 sm:$0xff]  }
  0x5f   :  { %323 = vmatpush1.bf16.msra.mxu0 %v1843_v31  ;;  %364 = vmatpush1.bf16.msra.mxu1 %v1844_v32  ;;  %v1928_v23 = vld [vmem:[#allocation8 + $0x274] ss:$12 sps:$4 sm:$0xff]   ;;  %v1934_v27 = vld [vmem:[#allocation8 + $0x25c] ss:$12 sps:$4 sm:$0xff]   ;;  %v1937_v30 = vld [vmem:[#allocation8 + $0xc4] ss:$12 sps:$4 sm:$0xff]  }
  0x60   :  { %1059 = vmatprep.subr.bf16.mxu0 %v1847_v33  ;;  %1100 = vmatprep.subr.bf16.mxu1 %v1850_v34  ;;  %v1940_v31 = vld [vmem:[#allocation8 + $0x244] ss:$12 sps:$4 sm:$0xff]   ;;  %v1935_v32 = vld [vmem:[#allocation8 + $0xc0] ss:$12 sps:$4 sm:$0xff]   ;;  %s2143_s30 = smov [#allocation11]  }
  0x61   :  { %v1938_v33 = vld [vmem:[#allocation8 + $0x240] ss:$12 sps:$4 sm:$0xff]   ;;  %v1941_v34 = vld [vmem:[#allocation8 + $0x170] ss:$12 sps:$4 sm:$0xff]   ;;  %s1522_s8 = sshll.u32 %s2143_s30, 4  ;;  %s1523_s8 = int_to_ptr.vmem [resolvable:$true] %s1522_s8 }
  0x62   :  { %341 = vmatmul.mubr.bf16.vlgmr.msra.gmra.mxu0 %v93_v35  ;;  %382 = vmatmul.mubr.bf16.vlgmr.msra.gmra.mxu1 %v93_v35  ;;  %v1942_v35 = vld [vmem:[#allocation8 + $0x2f0] ss:$12 sps:$4 sm:$0xff]   ;;  %s2101_s9 = scalar_lea.vmem %s1523_s8, 128  ;;  %p2106_p12 = scmp.lt.s32.totalorder %s1523_s8, %s1523_s8 }
  0x63   :  { %1060 = vmatpush1.bf16.msra.mxu0 %v1845_v36  ;;  %1101 = vmatpush1.bf16.msra.mxu1 %v1848_v37  ;;  %v128_v36 = vlaneseq  ;;  %p2102_p11 = scmp.ne.s32.totalorder %s1523_s8, %s2101_s9  ;;  %p2107_p13 = scmp.lt.s32.totalorder %s2101_s9, %s2101_s9 }
  0x64   :  { %1061 = vmatprep.subr.bf16.mxu0 %v1853_v38  ;;  %1102 = vmatprep.subr.bf16.mxu1 %v1856_v39 }
  0x65   :  { %v2199_v37 = vshrl.u32 %v128_v36, 7  ;;  %v1972_v36 = vld [vmem:[#allocation8 + $0x188] ss:$12 sps:$4 sm:$0xff]   ;;  %p2108_p0 = por %p2107_p13, %p2106_p12 }
  0x67   :  { %1062 = vmatpush1.bf16.msra.mxu0 %v1851_v40  ;;  %1103 = vmatpush1.bf16.msra.mxu1 %v1854_v41  ;;  %v130_v38 = vsub.s32 0, %v2199_v37  ;;  %v138_v39 = vsub.s32 2, %v2199_v37  ;;  %v126_v40 = vld [vmem:[#allocation7] sm:$0xf]  ;;  %v134_v41 = vsub.s32 1, %v2199_v37  ;;  %p2109_p1 = pnand %p2108_p0, %p2102_p11 }
  0x68   :  { %1063 = vmatprep.subr.bf16.mxu0 %v1859_v42  ;;  %1104 = vmatprep.subr.bf16.mxu1 %v1862_v43  ;;  %v142_v42 = vsub.s32 3, %v2199_v37 }
  0x69   :  { %v131_v43 = vrot.slane %v126_v40, %v130_v38 }
  0x6b   :  { %1064 = vmatpush1.bf16.msra.mxu0 %v1857_v44  ;;  %1105 = vmatpush1.bf16.msra.mxu1 %v1860_v45  ;;  %v139_v44 = vrot.slane %v126_v40, %v138_v39  ;;  %v135_v45 = vrot.slane %v126_v40, %v134_v41 }
  0x6c   :  { %1065 = vmatprep.subr.bf16.mxu0 %v1865_v46  ;;  %1106 = vmatprep.subr.bf16.mxu1 %v1868_v47  ;;  %v143_v46 = vrot.slane %v126_v40, %v142_v42  ;;  %v1973_v40 = vld [vmem:[#allocation10 + $0x78] sm:$0xff]  }
  0x6d   :  { %v1974_v42 = vld [vmem:[#allocation10 + $0x38] sm:$0xff]  }
  0x6f   :  { %1066 = vmatpush1.bf16.msra.mxu0 %v1863_v48  ;;  %1107 = vmatpush1.bf16.msra.mxu1 %v1866_v49 }
  0x70   :  { %1067 = vmatprep.subr.bf16.mxu0 %v1871_v50  ;;  %1108 = vmatprep.subr.bf16.mxu1 %v1874_v51 }
  0x73   :  { %1068 = vmatpush1.bf16.msra.mxu0 %v1869_v52  ;;  %1109 = vmatpush1.bf16.msra.mxu1 %v1872_v53 }
  0x74   :  { %1069 = vmatprep.subr.bf16.mxu0 %v1877_v54  ;;  %1110 = vmatprep.subr.bf16.mxu1 %v1880_v55 }
  0x77   :  { %1070 = vmatpush1.bf16.msra.mxu0 %v1875_v56  ;;  %1111 = vmatpush1.bf16.msra.mxu1 %v1878_v57 }
  0x78   :  { %1071 = vmatprep.subr.bf16.mxu0 %v1883_v58  ;;  %1112 = vmatprep.subr.bf16.mxu1 %v1886_v59 }
  0x7b   :  { %1072 = vmatpush1.bf16.msra.mxu0 %v1881_v60  ;;  %1113 = vmatpush1.bf16.msra.mxu1 %v1884_v61 }
  0x7c   :  { %1073 = vmatprep.subr.bf16.mxu0 %v1889_v62  ;;  %1114 = vmatprep.subr.bf16.mxu1 %v1892_v63 }
  0x7f   :  { %1074 = vmatpush1.bf16.msra.mxu0 %v1887_v0  ;;  %1115 = vmatpush1.bf16.msra.mxu1 %v1890_v1 }
  0x80   :  { %1075 = vmatprep.subr.bf16.mxu0 %v1895_v2  ;;  %1116 = vmatprep.subr.bf16.mxu1 %v1898_v3 }
  0x83   :  { %1076 = vmatpush2.bf16.msra.mxu0 %v1893_v4  ;;  %1117 = vmatpush2.bf16.msra.mxu1 %v1896_v5  ;;  %v1943_v5 = vld [vmem:[#allocation8 + $0xb0] ss:$12 sps:$4 sm:$0xff]  }
  0x84   :  { %1077 = vmatprep.subr.bf16.mxu0 %v1901_v6  ;;  %1118 = vmatprep.subr.bf16.mxu1 %v1904_v7  ;;  %v1944_v6 = vld [vmem:[#allocation8 + $0x230] ss:$12 sps:$4 sm:$0xff]  }
  0x87   :  { %1078 = vmatpush2.bf16.msra.mxu0 %v1899_v8  ;;  %1119 = vmatpush2.bf16.msra.mxu1 %v1902_v9  ;;  %v1945_v9 = vld [vmem:[#allocation8 + $0x158] ss:$12 sps:$4 sm:$0xff]  }
  0x88   :  { %1079 = vmatprep.subr.bf16.mxu0 %v1907_v10  ;;  %1120 = vmatprep.subr.bf16.mxu1 %v1910_v11  ;;  %v1946_v10 = vld [vmem:[#allocation8 + $0x2d8] ss:$12 sps:$4 sm:$0xff]  }
  0x89   :  { %v1947_v11 = vld [vmem:[#allocation8 + $0x98] ss:$12 sps:$4 sm:$0xff]  }
  0x8b   :  { %1080 = vmatpush2.bf16.msra.mxu0 %v1905_v12  ;;  %1121 = vmatpush2.bf16.msra.mxu1 %v1908_v13  ;;  %v1948_v12 = vld [vmem:[#allocation8 + $0x218] ss:$12 sps:$4 sm:$0xff]   ;;  %v1949_v13 = vld [vmem:[#allocation8 + $0x140] ss:$12 sps:$4 sm:$0xff]  }
  0x8c   :  { %1081 = vmatprep.subr.bf16.mxu0 %v1913_v14  ;;  %1122 = vmatprep.subr.bf16.mxu1 %v1916_v15  ;;  %v1950_v14 = vld [vmem:[#allocation8 + $0x2c0] ss:$12 sps:$4 sm:$0xff]  }
  0x8d   :  { %v1951_v15 = vld [vmem:[#allocation8 + $0x80] ss:$12 sps:$4 sm:$0xff]  }
  0x8f   :  { %1082 = vmatpush2.bf16.msra.mxu0 %v1911_v16  ;;  %1123 = vmatpush2.bf16.msra.mxu1 %v1914_v17  ;;  %v1952_v16 = vld [vmem:[#allocation8 + $0x200] ss:$12 sps:$4 sm:$0xff]   ;;  %v1953_v17 = vld [vmem:[#allocation8 + $0x128] ss:$12 sps:$4 sm:$0xff]  }
  0x90   :  { %1083 = vmatprep.subr.bf16.mxu0 %v1919_v18  ;;  %1124 = vmatprep.subr.bf16.mxu1 %v1922_v19  ;;  %v1954_v18 = vld [vmem:[#allocation8 + $0x2a8] ss:$12 sps:$4 sm:$0xff]  }
  0x91   :  { %v1955_v19 = vld [vmem:[#allocation8 + $0x68] ss:$12 sps:$4 sm:$0xff]  }
  0x93   :  { %1084 = vmatpush2.bf16.msra.mxu0 %v1917_v20  ;;  %1125 = vmatpush2.bf16.msra.mxu1 %v1920_v21  ;;  %v1956_v20 = vld [vmem:[#allocation8 + $0x1e8] ss:$12 sps:$4 sm:$0xff]   ;;  %v1957_v21 = vld [vmem:[#allocation8 + $0x110] ss:$12 sps:$4 sm:$0xff]  }
  0x94   :  { %1085 = vmatprep.subr.bf16.mxu0 %v1925_v22  ;;  %1126 = vmatprep.subr.bf16.mxu1 %v1928_v23  ;;  %v1958_v22 = vld [vmem:[#allocation8 + $0x290] ss:$12 sps:$4 sm:$0xff]  }
  0x95   :  { %v1959_v23 = vld [vmem:[#allocation8 + $0x50] ss:$12 sps:$4 sm:$0xff]  }
  0x97   :  { %1086 = vmatpush2.bf16.msra.mxu0 %v1923_v24  ;;  %1127 = vmatpush2.bf16.msra.mxu1 %v1926_v25  ;;  %v1960_v24 = vld [vmem:[#allocation8 + $0x1d0] ss:$12 sps:$4 sm:$0xff]   ;;  %v1961_v25 = vld [vmem:[#allocation8 + $0xf8] ss:$12 sps:$4 sm:$0xff]  }
  0x98   :  { %1087 = vmatprep.subr.bf16.mxu0 %v1931_v26  ;;  %1128 = vmatprep.subr.bf16.mxu1 %v1934_v27  ;;  %v1962_v26 = vld [vmem:[#allocation8 + $0x278] ss:$12 sps:$4 sm:$0xff]  }
  0x99   :  { %v1963_v27 = vld [vmem:[#allocation8 + $0x38] ss:$12 sps:$4 sm:$0xff]  }
  0x9b   :  { %1088 = vmatpush2.bf16.msra.mxu0 %v1929_v28  ;;  %1129 = vmatpush2.bf16.msra.mxu1 %v1932_v29  ;;  %v1964_v28 = vld [vmem:[#allocation8 + $0x1b8] ss:$12 sps:$4 sm:$0xff]   ;;  %v1965_v29 = vld [vmem:[#allocation8 + $0xe0] ss:$12 sps:$4 sm:$0xff]  }
  0x9c   :  { %1089 = vmatprep.subr.bf16.mxu0 %v1937_v30  ;;  %1130 = vmatprep.subr.bf16.mxu1 %v1940_v31  ;;  %v1966_v30 = vld [vmem:[#allocation8 + $0x260] ss:$12 sps:$4 sm:$0xff]  }
  0x9d   :  { %v1967_v31 = vld [vmem:[#allocation8 + $0x20] ss:$12 sps:$4 sm:$0xff]  }
  0x9f   :  { %1090 = vmatpush2.bf16.msra.mxu0 %v1935_v32  ;;  %1131 = vmatpush2.bf16.msra.mxu1 %v1938_v33  ;;  %v1968_v32 = vld [vmem:[#allocation8 + $0x1a0] ss:$12 sps:$4 sm:$0xff]   ;;  %v1969_v33 = vld [vmem:[#allocation8 + $0xc8] ss:$12 sps:$4 sm:$0xff]  }
  0xa0   :  { %1687 = vmatprep.subr.bf16.mxu0 %v1941_v34  ;;  %1709 = vmatprep.subr.bf16.mxu1 %v1942_v35  ;;  %v1970_v34 = vld [vmem:[#allocation8 + $0x248] ss:$12 sps:$4 sm:$0xff]  }
  0xa1   :  { %v1971_v35 = vld [vmem:[#allocation8 + $0x8] ss:$12 sps:$4 sm:$0xff]  }
 0x122   :  { %v342_v47 = vpop.f32.mrf.mxu0  ;;  %v383_v48 = vpop.f32.mrf.mxu1 }
 0x123   :  { %v343_v49 = vadd.f32 %v342_v47, %v131_v43  ;;  %v384_v50 = vadd.f32 %v383_v48, %v139_v44  ;;  %v1975_v43 = vld [vmem:[#allocation10 + $0x70] sm:$0xff]   ;;  %v1979_v47 = vld [vmem:[#allocation10 + $0x60] sm:$0xff]  }
 0x124   :  { %v344_v51 = vpop.f32.mrf.mxu0  ;;  %v385_v52 = vpop.f32.mrf.mxu1  ;;  %v1976_v44 = vld [vmem:[#allocation10 + $0x30] sm:$0xff]   ;;  %v1980_v48 = vld [vmem:[#allocation10 + $0x20] sm:$0xff]  }
 0x125   :  { %v390_v53 = vpack.c.bf16 %v343_v49, %v343_v49  ;;  %v392_v54 = vpack.c.bf16 %v384_v50, %v384_v50  ;;  %v345_v55 = vadd.f32 %v344_v51, %v135_v45  ;;  %v386_v56 = vadd.f32 %v385_v52, %v143_v46  ;;  %v1977_v45 = vld [vmem:[#allocation10 + $0x68] sm:$0xff]   ;;  %v1981_v49 = vld [vmem:[#allocation10 + $0x58] sm:$0xff]   ;;  %v1983_v51 = vld [vmem:[#allocation10 + $0x50] sm:$0xff]  }
 0x126   :  { %v346_v57 = vpop.f32.mrf.mxu0  ;;  %v387_v58 = vpop.f32.mrf.mxu1  ;;  %v1978_v46 = vld [vmem:[#allocation10 + $0x28] sm:$0xff]   ;;  %v1982_v50 = vld [vmem:[#allocation10 + $0x18] sm:$0xff]   ;;  %v1984_v52 = vld [vmem:[#allocation10 + $0x10] sm:$0xff]  }
 0x127   :  { %v391_v59 = vpack.c.bf16 %v345_v55, %v345_v55  ;;  %v393_v60 = vpack.c.bf16 %v386_v56, %v386_v56  ;;  %v394_v61 = vmul.bf16 1009007652, %v390_v53  ;;  %v396_v62 = vmul.bf16 1009007652, %v392_v54  ;;  %v1987_v55 = vld [vmem:[#allocation10 + $0x40] sm:$0xff]   ;;  %v1989_v57 = vld [vmem:[#allocation10 + $0xb8] sm:$0xff]  }
 0x128   :  { %v347_v63 = vpop.f32.mrf.mxu0  ;;  %v388_v0 = vpop.f32.mrf.mxu1  ;;  %v1988_v56 = vld [vmem:[#allocation10] sm:$0xff]   ;;  %v2141_v58 = vmov 0.0  }
 0x129   :  { %v395_v1 = vmul.bf16 1009007652, %v391_v59  ;;  %v397_v2 = vmul.bf16 1009007652, %v393_v60  ;;  %v2211_v7 = vmax.bf16 %v394_v61, %v390_v53  ;;  %v2213_v8 = vmax.bf16 %v396_v62, %v392_v54  ;;  %v1985_v53 = vld [vmem:[#allocation10 + $0x48] sm:$0xff]   ;;  %v1992_v61 = vld [vmem:[#allocation10 + $0xa0] sm:$0xff]  }
 0x12a   :  { %v1986_v54 = vld [vmem:[#allocation10 + $0x8] sm:$0xff]   ;;  %v1993_v62 = vld [vmem:[#allocation10 + $0x98] sm:$0xff]   ;;  %v1994_v63 = vld [vmem:[#allocation10 + $0x90] sm:$0xff]  }
 0x12b   :  { %v399_v3 = vmax.bf16 %v395_v1, %v391_v59  ;;  %v401_v4 = vmax.bf16 %v397_v2, %v393_v60  ;;  %v1990_v59 = vld [vmem:[#allocation10 + $0xb0] sm:$0xff]   ;;  %v1991_v60 = vld [vmem:[#allocation10 + $0xa8] sm:$0xff]   ;;  %v1996_v1 = vld [vmem:[#allocation10 + $0x80] sm:$0xff]  }
 0x12c   :  { %v1995_v0 = vld [vmem:[#allocation10 + $0x88] sm:$0xff]   ;;  %v530_v2 = vld [vmem:[%s2238_s4] sm:$0x7] }
 0x12d   :  { %1091 = vmatprep.mubr.bf16.mxu0 %v399_v3  ;;  %1132 = vmatprep.mubr.bf16.mxu1 %v401_v4 }
 0x12e   :  { %1092 = vmatmul.mubr.bf16.vlgmr.msra.gmra.mxu0 %v2211_v7  ;;  %1133 = vmatmul.mubr.bf16.vlgmr.msra.gmra.mxu1 %v2213_v8 }
 0x12f   :  { %1688 = vmatpush3.bf16.msra.mxu0 %v1943_v5  ;;  %1710 = vmatpush3.bf16.msra.mxu1 %v1944_v6 }
 0x130   :  { %1173 = vmatprep.mubr.bf16.mxu0 %v399_v3  ;;  %1213 = vmatprep.mubr.bf16.mxu1 %v401_v4  ;;  %v535_v3 = vrot.slane %v530_v2, %v130_v38  ;;  %v539_v4 = vrot.slane %v530_v2, %v134_v41 }
 0x131   :  { %1689 = vmatprep.subr.bf16.mxu0 %v1945_v9  ;;  %1711 = vmatprep.subr.bf16.mxu1 %v1946_v10 }
 0x133   :  { %1690 = vmatpush3.bf16.msra.mxu0 %v1947_v11  ;;  %1712 = vmatpush3.bf16.msra.mxu1 %v1948_v12 }
 0x134   :  { %1691 = vmatprep.subr.bf16.mxu0 %v1949_v13  ;;  %1713 = vmatprep.subr.bf16.mxu1 %v1950_v14 }
 0x137   :  { %1692 = vmatpush3.bf16.msra.mxu0 %v1951_v15  ;;  %1714 = vmatpush3.bf16.msra.mxu1 %v1952_v16 }
 0x138   :  { %1693 = vmatprep.subr.bf16.mxu0 %v1953_v17  ;;  %1715 = vmatprep.subr.bf16.mxu1 %v1954_v18 }
 0x13b   :  { %1694 = vmatpush3.bf16.msra.mxu0 %v1955_v19  ;;  %1716 = vmatpush3.bf16.msra.mxu1 %v1956_v20 }
 0x13c   :  { %1695 = vmatprep.subr.bf16.mxu0 %v1957_v21  ;;  %1717 = vmatprep.subr.bf16.mxu1 %v1958_v22 }
 0x13f   :  { %1696 = vmatpush3.bf16.msra.mxu0 %v1959_v23  ;;  %1718 = vmatpush3.bf16.msra.mxu1 %v1960_v24  ;;  %v543_v23 = vrot.slane %v530_v2, %v138_v39  ;;  %v1661_v39 = vld [vmem:[%s2240_s6] ss:$0 sm:$0xff] }
 0x140   :  { %1697 = vmatprep.subr.bf16.mxu0 %v1961_v25  ;;  %1719 = vmatprep.subr.bf16.mxu1 %v1962_v26 }
 0x143   :  { %1698 = vmatpush3.bf16.msra.mxu0 %v1963_v27  ;;  %1720 = vmatpush3.bf16.msra.mxu1 %v1964_v28 }
 0x144   :  { %1699 = vmatprep.subr.bf16.mxu0 %v1965_v29  ;;  %1721 = vmatprep.subr.bf16.mxu1 %v1966_v30 }
 0x147   :  { %1700 = vmatpush3.bf16.msra.mxu0 %v1967_v31  ;;  %1722 = vmatpush3.bf16.msra.mxu1 %v1968_v32 }
 0x148   :  { %1701 = vmatprep.subr.bf16.mxu0 %v1969_v33  ;;  %1723 = vmatprep.subr.bf16.mxu1 %v1970_v34 }
 0x14b   :  { %1702 = vmatpush3.bf16.msra.mxu0 %v1971_v35  ;;  %1724 = vmatpush3.bf16.msra.mxu1 %v1972_v36 }
 0x14c   :  { %1731 = vmatprep.subr.bf16.mxu0 %v1973_v40  ;;  %1762 = vmatprep.subr.bf16.mxu1 %v2141_v58 }
 0x14e   :  { %1174 = vmatmul.mubr.bf16.vlgmr.msra.gmra.mxu0 %v2211_v7  ;;  %1214 = vmatmul.mubr.bf16.vlgmr.msra.gmra.mxu1 %v2213_v8 }
 0x14f   :  { %1732 = vmatpush3.bf16.msra.mxu0 %v1974_v42  ;;  %1763 = vmatpush3.bf16.msra.mxu1 %v1989_v57 }
 0x150   :  { %1733 = vmatprep.subr.bf16.mxu0 %v1975_v43  ;;  %1764 = vmatprep.subr.bf16.mxu1 %v2141_v58 }
 0x151   :  { %1778 = vmatprep.mubr.msk.bf16.mxu1 %vm2142_vm0, %v2141_v58 }
 0x153   :  { %1734 = vmatpush3.bf16.msra.mxu0 %v1976_v44  ;;  %1765 = vmatpush3.bf16.msra.mxu1 %v1990_v59 }
 0x154   :  { %1735 = vmatprep.subr.bf16.mxu0 %v1977_v45  ;;  %1766 = vmatprep.subr.bf16.mxu1 %v2141_v58 }
 0x157   :  { %1736 = vmatpush3.bf16.msra.mxu0 %v1978_v46  ;;  %1767 = vmatpush3.bf16.msra.mxu1 %v1991_v60 }
 0x158   :  { %1737 = vmatprep.subr.bf16.mxu0 %v1979_v47  ;;  %1768 = vmatprep.subr.bf16.mxu1 %v2141_v58 }
 0x15b   :  { %1738 = vmatpush3.bf16.msra.mxu0 %v1980_v48  ;;  %1769 = vmatpush3.bf16.msra.mxu1 %v1992_v61 }
 0x15c   :  { %1739 = vmatprep.subr.bf16.mxu0 %v1981_v49  ;;  %1770 = vmatprep.subr.bf16.mxu1 %v2141_v58 }
 0x15f   :  { %1740 = vmatpush3.bf16.msra.mxu0 %v1982_v50  ;;  %1771 = vmatpush3.bf16.msra.mxu1 %v1993_v62 }
 0x160   :  { %1741 = vmatprep.subr.bf16.mxu0 %v1983_v51  ;;  %1772 = vmatprep.subr.bf16.mxu1 %v2141_v58 }
 0x163   :  { %1742 = vmatpush3.bf16.msra.mxu0 %v1984_v52  ;;  %1773 = vmatpush3.bf16.msra.mxu1 %v1994_v63 }
 0x164   :  { %1743 = vmatprep.subr.bf16.mxu0 %v1985_v53  ;;  %1774 = vmatprep.subr.bf16.mxu1 %v2141_v58 }
 0x167   :  { %1744 = vmatpush3.bf16.msra.mxu0 %v1986_v54  ;;  %1775 = vmatpush3.bf16.msra.mxu1 %v1995_v0 }
 0x168   :  { %1745 = vmatprep.subr.bf16.mxu0 %v1987_v55  ;;  %1776 = vmatprep.subr.bf16.mxu1 %v2141_v58 }
 0x16b   :  { %1746 = vmatpush3.bf16.msra.mxu0 %v1988_v56  ;;  %1777 = vmatpush3.bf16.msra.mxu1 %v1996_v1 }
 0x1ee   :  { %v1093_v5 = vpop.f32.mrf.mxu0  ;;  %v1134_v6 = vpop.f32.mrf.mxu1 }
 0x1ef   :  { %v1094_v7 = vadd.f32 %v1093_v5, %v535_v3 }
 0x1f0   :  { %v1095_v8 = vpop.f32.mrf.mxu0  ;;  %v1136_v9 = vpop.f32.mrf.mxu1 }
 0x1f1   :  { %v1135_v10 = vadd.f32 %v1134_v6, %v1094_v7  ;;  %v1096_v11 = vadd.f32 %v1095_v8, %v539_v4 }
 0x1f2   :  { %v1097_v12 = vpop.f32.mrf.mxu0  ;;  %v1138_v13 = vpop.f32.mrf.mxu1 }
 0x1f3   :  { %v1221_v14 = vpack.c.bf16 %v1135_v10, %v1135_v10  ;;  %v1137_v15 = vadd.f32 %v1136_v9, %v1096_v11 }
 0x1f4   :  { %v1098_v16 = vpop.f32.mrf.mxu0  ;;  %v1139_v17 = vpop.f32.mrf.mxu1 }
 0x1f5   :  { %v1222_v18 = vpack.c.bf16 %v1137_v15, %v1137_v15  ;;  %v1224_v19 = vmul.bf16 1009007652, %v1221_v14 }
 0x1f7   :  { %v1225_v20 = vmul.bf16 1009007652, %v1222_v18  ;;  %v1227_v21 = vmax.bf16 %v1224_v19, %v1221_v14 }
 0x1f9   :  { %v1228_v38 = vmax.bf16 %v1225_v20, %v1222_v18 }
 0x1fb   :  { %1461 = vmatprep.mubr.bf16.mxu0 %v1228_v38 }
 0x1fc   :  { %1462 = vmatmul.mubr.bf16.vlgmr.msra.gmra.mxu0 %v1227_v21 }
 0x20e   :  { %v1703_v41 = vpop.f32.mrf.mxu0  ;;  %v1725_v22 = vpop.f32.mrf.mxu1 }
 0x210   :  { %v1704_v24 = vpop.f32.mrf.mxu0  ;;  %v1726_v25 = vpop.f32.mrf.mxu1 }
 0x211   :  { %v1705_v26 = vadd.f32 %v1704_v24, %v1703_v41  ;;  %v1727_v30 = vadd.f32 %v1726_v25, %v1725_v22 }
 0x212   :  { %v1706_v27 = vpop.f32.mrf.mxu0  ;;  %v1728_v28 = vpop.f32.mrf.mxu1 }
 0x213   :  { %v1176_v29 = vadd.f32 %v1705_v26, %v543_v23 }
 0x214   :  { %v1707_v31 = vpop.f32.mrf.mxu0  ;;  %v1729_v32 = vpop.f32.mrf.mxu1 }
 0x215   :  { %v1216_v33 = vadd.f32 %v1727_v30, %v1176_v29 }
 0x217   :  { %v1223_v34 = vpack.c.bf16 %v1216_v33, %v1216_v33 }
 0x219   :  { %v1226_v35 = vmul.bf16 1009007652, %v1223_v34 }
 0x21b   :  { %v1229_v36 = vmax.bf16 %v1226_v35, %v1223_v34 }
 0x21d   :  { %1779 = vmatmul.mubr.bf16.vlgmr.msra.gmra.mxu1 %v1229_v36 }
 0x2bc   :  { %v1747_v40 = vpop.f32.mrf.mxu0 }
 0x2be   :  { %v1748_v42 = vpop.f32.mrf.mxu0 }
 0x2bf   :  { %v1749_v37 = vadd.f32 %v1748_v42, %v1747_v40 }
 0x2c0   :  { %v1750_v43 = vpop.f32.mrf.mxu0 }
 0x2c1   :  { %v1464_v45 = vadd.f32 %v1749_v37, %v1661_v39 }
 0x2c2   :  { %v1751_v44 = vpop.f32.mrf.mxu0 }
 0x2dd   :  { %v1503_v46 = vpop.f32.mrf.mxu1 }
 0x2de   :  { %v1504_v47 = vadd.f32 %v1503_v46, %v1464_v45 }
 0x2df   :  { %v1780_v48 = vpop.f32.mrf.mxu1 }
 0x2e0   :  { %v1686_v49 = vmul.f32 -1.442695, %v1504_v47 }
 0x2e1   :  { %v1506_v50 = vpop.f32.mrf.mxu1 }
 0x2e2   :  { %1997 = vpow2.f32 %v1686_v49 }
 0x2e3   :  { %v1781_v51 = vpop.f32.mrf.mxu1 }
 0x2ef   :  { %v1998_v52 = vpop.eup %1997 }
 0x2f0   :  { %v1512_v53 = vadd.f32 1.0, %v1998_v52 }
 0x2f2   :  { %1999 = vrcp.f32 %v1512_v53 }
 0x2ff   :  { %v2000_v54 = vpop.eup %1999 }
 0x300   :  { %1515 = vst [vmem:[#allocation11] sm:$0xff] %v2000_v54 }
 0x301   :  { %2112 = shalt.err (!%p2109_p1)
}
 0x302   :  { %1525 = dma.vmem_to_hbm [thread:$0]  %s1523_s8, 128, %s2241_s7, [#allocation4]  }
 0x303   :  { %2127 = dma.done.wait [#allocation4], 128  }
 0x304   :  { %2128 = vsyncadd [#allocation4], 4294967168 }
 0x305   :  { %1529 = vsyncpa [#allocation3], 1 }
 0x306   :  { %1530 = vsyncpa [#allocation6], 1 }
 0x307   :  { %1531 = vsyncpa [#allocation9], 1 }
 0x308   :  { %1532 = vsyncpa [#allocation4], 1 }

</bundles_post_ra>
